<compile_context>
chip_gen: v7x
topology: tpu7x:2x2x1
jax: 0.10.0
libtpu: 0.0.40
codegen_flags: <defaults>
</compile_context>

<pallas_src>
import functools

import jax
import jax.numpy as jnp
from jax.experimental import pallas as pl
from jax.experimental.pallas import tpu as pltpu


def _round_up(x, m):
    return (x + m - 1) // m * m


def _make_ffb_kernel(plan):
    """Build the fused FeedForwardBlock kernel.

    plan: static tuple of (use_vpu, in_dim, out_dim) per layer.
    Kernel refs: (x_ref, w_0, b_0, w_1, b_1, ..., o_ref).
    """

    def kernel(*refs):
        x_ref = refs[0]
        o_ref = refs[-1]
        params = refs[1:-1]
        h = x_ref[...]
        for li, (use_vpu, _k, _n) in enumerate(plan):
            w_ref = params[2 * li]
            b_ref = params[2 * li + 1]
            if use_vpu:
                # out_dim == 1: VPU broadcast-multiply + XLU lane reduction;
                # bias is a scalar read from SMEM.
                h = jnp.sum(h * w_ref[...], axis=-1, keepdims=True) + b_ref[0, 0]
            else:
                h = (
                    jnp.dot(h, w_ref[...], preferred_element_type=jnp.float32)
                    + b_ref[...]
                )
        o_ref[...] = h.astype(o_ref.dtype)

    return kernel


def feed_forward_pallas(x, params, plan):
    """y = Linear_n(...Linear_1(x)...) computed in one Pallas TPU kernel.

    x:      [B, K0] float32
    params: list of (w, b); w is [1, K] for out_dim==1 layers (VPU path) and
            [K, N] otherwise; b is [1, 1] (SMEM scalar) or [1, N] (VMEM).
    plan:   static tuple of (use_vpu, in_dim, out_dim) per layer.
    """
    B, K0 = x.shape
    assert K0 == plan[0][1]
    n_out = plan[-1][2]

    # Batch tile: as large as possible (HBM roofline) while keeping each x
    # buffer <= ~4 MiB so double-buffering fits every generation's
    # scoped-VMEM default with headroom.
    rows_by_vmem = max(8, ((4 * 1024 * 1024) // (4 * K0)) // 8 * 8)
    tm = max(8, (min(512, _round_up(B, 8), rows_by_vmem) // 8) * 8)
    b_pad = _round_up(B, tm)
    if b_pad != B:
        x = jnp.pad(x, ((0, b_pad - B), (0, 0)))
    grid = (b_pad // tm,)

    in_specs = [pl.BlockSpec((tm, K0), lambda i: (i, 0))]
    inputs = [x]
    for (use_vpu, _k, _n), (w, b) in zip(plan, params):
        # Weights/biases: full-array blocks with a constant index map, so they
        # stay resident in VMEM across all batch tiles (no re-DMA).
        in_specs.append(pl.BlockSpec(w.shape, lambda i: (0, 0)))
        inputs.append(w)
        if use_vpu:
            # Scalar bias -> SMEM (avoids a padded (8,128) VMEM tile + DMA).
            in_specs.append(pl.BlockSpec(memory_space=pltpu.MemorySpace.SMEM))
        else:
            in_specs.append(pl.BlockSpec(b.shape, lambda i: (0, 0)))
        inputs.append(b)

    flops = 2 * b_pad * sum(k * n for _, k, n in plan)
    bytes_accessed = 4 * (
        b_pad * K0 + sum(w.size + b.size for w, b in params) + b_pad * n_out
    )

    y = pl.pallas_call(
        _make_ffb_kernel(plan),
        out_shape=jax.ShapeDtypeStruct((b_pad, n_out), x.dtype),
        grid_spec=pltpu.PrefetchScalarGridSpec(
            num_scalar_prefetch=0,
            grid=grid,
            in_specs=in_specs,
            out_specs=pl.BlockSpec((tm, n_out), lambda i: (i, 0)),
        ),
        compiler_params=pltpu.CompilerParams(
            dimension_semantics=("parallel",),
            vmem_limit_bytes=32 * 1024 * 1024,
        ),
        cost_estimate=pl.CostEstimate(
            flops=flops, transcendentals=0, bytes_accessed=bytes_accessed
        ),
    )(*inputs)

    return y[:B] if b_pad != B else y


class RegressionHeadPallas:
    """JAX/Pallas port of FARM RegressionHead.forward (FeedForwardBlock of Linears)."""

    def __init__(self, layer_dims=(32, 1), key=jax.random.PRNGKey(0)):
        self.layer_dims = list(layer_dims)
        plan = []
        params = []
        for i in range(len(self.layer_dims) - 1):
            fan_in = self.layer_dims[i]
            fan_out = self.layer_dims[i + 1]
            use_vpu = fan_out == 1
            key, wk, bk = jax.random.split(key, 3)
            bound = 1.0 / float(fan_in) ** 0.5
            if use_vpu:
                # Row layout [out, in] so the kernel broadcast-multiplies.
                w = jax.random.uniform(
                    wk, (fan_out, fan_in), jnp.float32, -bound, bound
                )
            else:
                # [in, out] so the kernel computes x @ W on the MXU.
                w = jax.random.uniform(
                    wk, (fan_in, fan_out), jnp.float32, -bound, bound
                )
            b = jax.random.uniform(bk, (1, fan_out), jnp.float32, -bound, bound)
            plan.append((use_vpu, fan_in, fan_out))
            params.append((w, b))
        self.plan = tuple(plan)
        self.params = params

    @functools.partial(jax.jit, static_argnums=0)
    def __call__(self, x):
        # nn.Linear applies to the last dim; flatten any leading dims.
        lead = x.shape[:-1]
        x2d = x.reshape(-1, x.shape[-1])
        y = feed_forward_pallas(x2d, self.params, self.plan)
        return y.reshape(*lead, y.shape[-1])

    def reference(self, x):
        out = x
        for (use_vpu, _k, _n), (w, b) in zip(self.plan, self.params):
            out = out @ (w.T if use_vpu else w) + b
        return out


if __name__ == "__main__":
    key = jax.random.PRNGKey(0)
    batch, hidden = 2, 32
    x = jax.random.normal(key, (batch, hidden), jnp.float32)

    # Default RegressionHead: a single Linear [hidden -> 1] (VPU/XLU path).
    head = RegressionHeadPallas(layer_dims=[hidden, 1], key=jax.random.PRNGKey(0))
    logits = head(x)
    jax.block_until_ready(logits)
    assert logits.shape == (batch, 1)
    assert jnp.allclose(logits, head.reference(x), atol=1e-5, rtol=1e-5)

    # Deeper FeedForwardBlock exercising the fused multi-layer path
    # (MXU layer followed by the out_dim==1 VPU layer, still one pallas_call).
    deep = RegressionHeadPallas(layer_dims=[hidden, 64, 1], key=jax.random.PRNGKey(1))
    deep_logits = deep(x)
    jax.block_until_ready(deep_logits)
    assert deep_logits.shape == (batch, 1)
    assert jnp.allclose(deep_logits, deep.reference(x), atol=1e-5, rtol=1e-5)

    print("KERNEL_OK")
</pallas_src>

<mosaic_0001>
module attributes {stable_mosaic.version = 11 : i64} {
  func.func @kernel(%arg0: i32, %arg1: memref<8x32xf32, #tpu.memory_space<vmem>>, %arg2: memref<1x32xf32, #tpu.memory_space<vmem>>, %arg3: memref<1x1xf32, #tpu.memory_space<smem>>, %arg4: memref<8x1xf32, #tpu.memory_space<vmem>>) attributes {dimension_semantics = [#tpu.dimension_semantics<parallel>], iteration_bounds = array<i64: 1>, scalar_prefetch = 0 : i64, scratch_operands = 0 : i64, tpu.core_type = #tpu.core_type<tc>, window_params = [{transform_indices = @transform_0, window_bounds = array<i64: 8, 32>}, {pipeline_mode = #tpu.pipeline_mode<synchronous>, transform_indices = @transform_1, window_bounds = array<i64: 1, 32>}, {transform_indices = @transform_2, window_bounds = array<i64: 1, 1>}, {transform_indices = @transform_3, window_bounds = array<i64: 8, 1>}]} {
    %c0 = arith.constant 0 : index
    %c0_0 = arith.constant 0 : index
    %0 = vector.load %arg1[%c0, %c0_0] : memref<8x32xf32, #tpu.memory_space<vmem>>, vector<8x32xf32>
    %c0_1 = arith.constant 0 : index
    %c0_2 = arith.constant 0 : index
    %1 = vector.load %arg2[%c0_1, %c0_2] : memref<1x32xf32, #tpu.memory_space<vmem>>, vector<1x32xf32>
    %2 = vector.broadcast %1 : vector<1x32xf32> to vector<8x32xf32>
    %3 = arith.mulf %0, %2 : vector<8x32xf32>
    %cst = arith.constant dense<0.000000e+00> : vector<8xf32>
    %4 = vector.multi_reduction <add>, %3, %cst [1] : vector<8x32xf32> to vector<8xf32>
    %5 = vector.shape_cast %4 : vector<8xf32> to vector<8x1xf32>
    %c0_3 = arith.constant 0 : index
    %c0_4 = arith.constant 0 : index
    %6 = memref.load %arg3[%c0_3, %c0_4] : memref<1x1xf32, #tpu.memory_space<smem>>
    %7 = vector.broadcast %6 : f32 to vector<8x1xf32>
    %8 = arith.addf %5, %7 : vector<8x1xf32>
    %c0_5 = arith.constant 0 : index
    %c0_6 = arith.constant 0 : index
    %9 = vector.load %arg4[%c0_5, %c0_6] : memref<8x1xf32, #tpu.memory_space<vmem>>, vector<8x1xf32>
    tpu.vector_store %arg4[%c0_5, %c0_6], %8 {strides = array<i32>} : memref<8x1xf32, #tpu.memory_space<vmem>>, vector<8x1xf32>,
    return
  }
  func.func @transform_0(%arg0: i32) -> (i32, i32) {
    %c0_i32 = arith.constant 0 : i32
    %c0_i32_0 = arith.constant 0 : i32
    return %arg0, %c0_i32 : i32, i32
  }
  func.func @transform_1(%arg0: i32) -> (i32, i32) {
    %c0_i32 = arith.constant 0 : i32
    %c0_i32_0 = arith.constant 0 : i32
    %c0_i32_1 = arith.constant 0 : i32
    return %c0_i32, %c0_i32_0 : i32, i32
  }
  func.func @transform_2(%arg0: i32) -> (i32, i32) {
    %c0_i32 = arith.constant 0 : i32
    %c0_i32_0 = arith.constant 0 : i32
    %c0_i32_1 = arith.constant 0 : i32
    return %c0_i32, %c0_i32_0 : i32, i32
  }
  func.func @transform_3(%arg0: i32) -> (i32, i32) {
    %c0_i32 = arith.constant 0 : i32
    %c0_i32_0 = arith.constant 0 : i32
    return %arg0, %c0_i32 : i32, i32
  }
}

</mosaic_0001>

<bundles_post_ra>
// kernel: a_call__.1
= control target key start
LH: loop header
LB: loop body
LE: loop exit
PB: predicated region body
PF: predicated region fallthrough
CT: control target
= control target key end

     0   :  { %vm24_vm0 = vcmask 261120   ;;  %vm31_vm1 = vcmask 7168   ;;  %s70_s0 = inlined_call_operand.vmem [shape: f32[8,32], index: 0, kind: input, shape index: {}]   ;;  %s71_s1 = inlined_call_operand.vmem [shape: f32[1,32], index: 1, kind: input, shape index: {}]   ;;  %s72_s2 = inlined_call_operand.<no memory space> [shape: f32[1,1], index: 2, kind: input, shape index: {}]   ;;  %s73_s3 = inlined_call_operand.vmem [shape: f32[8,1], index: 3, kind: output, shape index: {}]  }
   0x1   :  { %v15_v0 = vld [vmem:[%s70_s0] sm:$0xff]  ;;  %v29_v4 = vstv %s72_s2 }
   0x2   :  { %v37_v1 = vld [vmem:[%s71_s1] ss:$0 sm:$0xff] }
   0x3   :  { %v23_v2 = vmul.f32 %v37_v1, %v15_v0 }
   0x5   :  { %v25_v3 = vsel %vm24_vm0, %v23_v2, 0.0 }
   0x6   :  { %26 = vadd.xlane.f32.xlu0 %v25_v3 }
  0x93   :  { %v27_v5 = vpop.xlane.xlu0 %26 }
  0x94   :  { %v30_v6 = vadd.f32 %v29_v4, %v27_v5 }
  0x96   :  { %32 = vst.msk [vmem:[%s73_s3] sm:$0xff] %vm31_vm1, %v30_v6 }

</bundles_post_ra>
